<compile_context>
chip_gen: v5e
topology: v5e:2x2
jax: 0.10.0
libtpu: 0.0.40
codegen_flags: <defaults>
</compile_context>

<pallas_src>
import jax
import jax.numpy as jnp
from jax.experimental import pallas as pl
from jax.experimental.pallas import tpu as pltpu


def _round_up(n: int, m: int) -> int:
    return (n + m - 1) // m * m


def tabular_encoder_kernel(x_ref, w1_ref, b1_ref, w2_ref, b2_ref, o_ref):
    # Linear 1 (eval-mode BatchNorm already folded into w1/b1):
    # [TB, D_in] @ [D_in, H2p] on the MXU with f32 accumulation.
    h = jnp.dot(x_ref[...], w1_ref[...], preferred_element_type=jnp.float32)
    # Bias + ReLU + downcast fused into one pass over the [TB, H2p] intermediate.
    # Dropout(p=0.4) -> identity in eval mode.
    h = jnp.maximum(h + b1_ref[...], 0.0).astype(w2_ref.dtype)
    # Linear 2: [TB, H2p] @ [H2p, H] on the MXU with f32 accumulation.
    out = jnp.dot(h, w2_ref[...], preferred_element_type=jnp.float32)
    # Bias + ReLU + cast to output dtype. Dropout(p=0.3) -> identity in eval mode.
    o_ref[...] = jnp.maximum(out + b2_ref[...], 0.0).astype(o_ref.dtype)
    # TODO(synk): training-mode BatchNorm (batch statistics) and stochastic Dropout
    # are not implemented; this matches PyTorch .eval() forward semantics.


def _prepare_params(w1, b1, gamma, beta, running_mean, running_var, w2, b2,
                    eps, matmul_dtype):
    """Fold eval-mode BN into Linear1; lane-pad only the intermediate H2 dim; cast."""
    D_in, H2 = w1.shape
    H = w2.shape[1]
    H2p = _round_up(H2, 128)   # 192 -> 256 : lane-dense intermediate

    bn_scale = gamma / jnp.sqrt(running_var + eps)
    bn_shift = beta - running_mean * bn_scale
    w1f = w1 * bn_scale[None, :]
    b1f = b1 * bn_scale + bn_shift

    w1p = jnp.zeros((D_in, H2p), jnp.float32).at[:, :H2].set(w1f)
    b1p = jnp.zeros((1, H2p), jnp.float32).at[0, :H2].set(b1f)
    w2p = jnp.zeros((H2p, H), jnp.float32).at[:H2, :].set(w2)
    b2p = b2.reshape(1, H).astype(jnp.float32)

    return (w1p.astype(matmul_dtype), b1p, w2p.astype(matmul_dtype), b2p, H2p)


def tabular_encoder(x, w1, b1, gamma, beta, running_mean, running_var, w2, b2,
                    *, eps=1e-5, block_b=2048, matmul_dtype=jnp.bfloat16,
                    out_dtype=jnp.bfloat16):
    B, D_in = x.shape
    H = w2.shape[1]

    w1p, b1p, w2p, b2p, H2p = _prepare_params(
        w1, b1, gamma, beta, running_mean, running_var, w2, b2, eps, matmul_dtype)

    # Batch tile: multiple of 8 (sublane), capped by block_b. The cdiv(B, 2) cap keeps
    # at least 2 grid steps whenever B allows, so "parallel" can shard across the
    # 2 TensorCores on v7x. The last block may be ragged (no wrapper-side padding).
    tb = max(8, min(_round_up(block_b, 8), _round_up(pl.cdiv(B, 2), 8)))
    grid_b = pl.cdiv(B, tb)

    out = pl.pallas_call(
        tabular_encoder_kernel,
        out_shape=jax.ShapeDtypeStruct((B, H), out_dtype),
        grid=(grid_b,),
        in_specs=[
            pl.BlockSpec((tb, D_in), lambda i: (i, 0)),     # x: tiled over batch
            pl.BlockSpec((D_in, H2p), lambda i: (0, 0)),    # w1: resident across grid
            pl.BlockSpec((1, H2p), lambda i: (0, 0)),       # b1: resident
            pl.BlockSpec((H2p, H), lambda i: (0, 0)),       # w2: resident
            pl.BlockSpec((1, H), lambda i: (0, 0)),         # b2: resident
        ],
        out_specs=pl.BlockSpec((tb, H), lambda i: (i, 0)),  # true-width (96) store
        compiler_params=pltpu.CompilerParams(
            dimension_semantics=("parallel",),              # megacore-shard batch axis
            vmem_limit_bytes=32 * 1024 * 1024,              # headroom for big tiles (v5e)
        ),
    )(x.astype(matmul_dtype), w1p, b1p, w2p, b2p)

    return out


def reference_forward_f32(x, w1, b1, gamma, beta, running_mean, running_var,
                          w2, b2, eps=1e-5):
    """Pure-f32 JAX equivalent of the PyTorch module in .eval()."""
    h = x @ w1 + b1
    h = (h - running_mean) / jnp.sqrt(running_var + eps) * gamma + beta
    h = jnp.maximum(h, 0.0)
    out = h @ w2 + b2
    return jnp.maximum(out, 0.0)


def reference_forward_matched(x, w1, b1, gamma, beta, running_mean, running_var,
                              w2, b2, eps=1e-5, matmul_dtype=jnp.bfloat16,
                              out_dtype=jnp.float32):
    """Same folding/padding/bf16 casts as the wrapper (isolates kernel correctness)."""
    w1p, b1p, w2p, b2p, _ = _prepare_params(
        x.dtype.type and w1, b1, gamma, beta, running_mean, running_var, w2, b2,
        eps, matmul_dtype) if False else _prepare_params(
        w1, b1, gamma, beta, running_mean, running_var, w2, b2, eps, matmul_dtype)
    h = jnp.dot(x.astype(matmul_dtype), w1p, preferred_element_type=jnp.float32)
    h = jnp.maximum(h + b1p, 0.0).astype(matmul_dtype)
    out = jnp.dot(h, w2p, preferred_element_type=jnp.float32)
    out = jnp.maximum(out + b2p, 0.0)
    return out.astype(out_dtype)


if __name__ == "__main__":
    # Small shapes consistent with the module: TabularEncoder(input_dim=32, hidden_dim=96)
    B, D_IN, HID = 8, 32, 96
    H2 = HID * 2

    key = jax.random.PRNGKey(0)
    kx, kw1, kb1, kg, kbt, krm, krv, kw2, kb2, kx2 = jax.random.split(key, 10)

    x = jax.random.normal(kx, (B, D_IN), dtype=jnp.float32)

    # Deterministic synthetic parameters (shapes from nn.Linear / nn.BatchNorm1d).
    w1 = jax.random.normal(kw1, (D_IN, H2), dtype=jnp.float32) * 0.1
    b1 = jax.random.normal(kb1, (H2,), dtype=jnp.float32) * 0.1
    gamma = 1.0 + 0.1 * jax.random.normal(kg, (H2,), dtype=jnp.float32)
    beta = 0.1 * jax.random.normal(kbt, (H2,), dtype=jnp.float32)
    running_mean = 0.1 * jax.random.normal(krm, (H2,), dtype=jnp.float32)
    running_var = jnp.abs(1.0 + 0.1 * jax.random.normal(krv, (H2,), dtype=jnp.float32))
    w2 = jax.random.normal(kw2, (H2, HID), dtype=jnp.float32) * 0.1
    b2 = jax.random.normal(kb2, (HID,), dtype=jnp.float32) * 0.1

    params = (w1, b1, gamma, beta, running_mean, running_var, w2, b2)

    # --- Default path: bf16 output (halves the dominant HBM write stream) ---
    out_bf16 = tabular_encoder(x, *params)
    out_bf16 = jax.block_until_ready(out_bf16)
    assert out_bf16.shape == (B, HID), out_bf16.shape
    assert out_bf16.dtype == jnp.bfloat16, out_bf16.dtype
    ref_bf16 = reference_forward_matched(x, *params, out_dtype=jnp.bfloat16)
    assert jnp.allclose(out_bf16.astype(jnp.float32), ref_bf16.astype(jnp.float32),
                        atol=1e-2, rtol=1e-2), "bf16-output mismatch vs matched reference"

    # --- f32 output path: tight check vs bit-matched reference, loose vs pure-f32 ---
    out_f32 = tabular_encoder(x, *params, out_dtype=jnp.float32)
    out_f32 = jax.block_until_ready(out_f32)
    assert out_f32.shape == (B, HID) and out_f32.dtype == jnp.float32
    ref_matched = reference_forward_matched(x, *params, out_dtype=jnp.float32)
    assert jnp.allclose(out_f32, ref_matched, atol=1e-3, rtol=1e-3), \
        "mismatch vs bit-matched reference"
    ref_f32 = reference_forward_f32(x, *params)
    assert jnp.allclose(out_f32, ref_f32, atol=5e-2, rtol=5e-2), \
        "mismatch vs f32 reference (beyond bf16 quantization tolerance)"

    # --- Ragged last-block path: B not a multiple of the batch tile / sublane count ---
    B2 = 13
    x2 = jax.random.normal(kx2, (B2, D_IN), dtype=jnp.float32)
    out2 = tabular_encoder(x2, *params, out_dtype=jnp.float32)
    out2 = jax.block_until_ready(out2)
    assert out2.shape == (B2, HID), out2.shape
    ref2 = reference_forward_matched(x2, *params, out_dtype=jnp.float32)
    assert jnp.allclose(out2, ref2, atol=1e-3, rtol=1e-3), \
        "ragged-batch mismatch vs bit-matched reference"

    print("KERNEL_OK")
</pallas_src>

<mosaic_0001>
module attributes {stable_mosaic.version = 11 : i64} {
  func.func @tabular_encoder_kernel(%arg0: i32, %arg1: memref<8x32xbf16, #tpu.memory_space<vmem>>, %arg2: memref<32x256xbf16, #tpu.memory_space<vmem>>, %arg3: memref<1x256xf32, #tpu.memory_space<vmem>>, %arg4: memref<256x96xbf16, #tpu.memory_space<vmem>>, %arg5: memref<1x96xf32, #tpu.memory_space<vmem>>, %arg6: memref<8x96xbf16, #tpu.memory_space<vmem>>) attributes {dimension_semantics = [#tpu.dimension_semantics<parallel>], iteration_bounds = array<i64: 1>, scalar_prefetch = 0 : i64, scratch_operands = 0 : i64, tpu.core_type = #tpu.core_type<tc>, window_params = [{transform_indices = @transform_0, window_bounds = array<i64: 8, 32>}, {pipeline_mode = #tpu.pipeline_mode<synchronous>, transform_indices = @transform_1, window_bounds = array<i64: 32, 256>}, {pipeline_mode = #tpu.pipeline_mode<synchronous>, transform_indices = @transform_2, window_bounds = array<i64: 1, 256>}, {pipeline_mode = #tpu.pipeline_mode<synchronous>, transform_indices = @transform_3, window_bounds = array<i64: 256, 96>}, {pipeline_mode = #tpu.pipeline_mode<synchronous>, transform_indices = @transform_4, window_bounds = array<i64: 1, 96>}, {transform_indices = @transform_5, window_bounds = array<i64: 8, 96>}]} {
    %c0 = arith.constant 0 : index
    %c0_0 = arith.constant 0 : index
    %0 = vector.load %arg1[%c0, %c0_0] : memref<8x32xbf16, #tpu.memory_space<vmem>>, vector<8x32xbf16>
    %c0_1 = arith.constant 0 : index
    %c0_2 = arith.constant 0 : index
    %1 = vector.load %arg2[%c0_1, %c0_2] : memref<32x256xbf16, #tpu.memory_space<vmem>>, vector<32x256xbf16>
    %cst = arith.constant dense<0.000000e+00> : vector<8x256xf32>
    %2 = tpu.matmul %0, %1, %cst {dimension_numbers = #tpu.dot_dimension_numbers<[1], [0], [0], [1], [0, 0, 1, 1], [], []>} : vector<8x32xbf16>, vector<32x256xbf16>, vector<8x256xf32> -> vector<8x256xf32>
    %c0_3 = arith.constant 0 : index
    %c0_4 = arith.constant 0 : index
    %3 = vector.load %arg3[%c0_3, %c0_4] : memref<1x256xf32, #tpu.memory_space<vmem>>, vector<1x256xf32>
    %4 = vector.broadcast %3 : vector<1x256xf32> to vector<8x256xf32>
    %5 = arith.addf %2, %4 : vector<8x256xf32>
    %cst_5 = arith.constant 0.000000e+00 : f32
    %6 = vector.broadcast %cst_5 : f32 to vector<8x256xf32>
    %7 = arith.maximumf %5, %6 : vector<8x256xf32>
    %8 = arith.truncf %7 : vector<8x256xf32> to vector<8x256xbf16>
    %c0_6 = arith.constant 0 : index
    %c0_7 = arith.constant 0 : index
    %9 = vector.load %arg4[%c0_6, %c0_7] : memref<256x96xbf16, #tpu.memory_space<vmem>>, vector<256x96xbf16>
    %cst_8 = arith.constant dense<0.000000e+00> : vector<8x96xf32>
    %10 = tpu.matmul %8, %9, %cst_8 {dimension_numbers = #tpu.dot_dimension_numbers<[1], [0], [0], [1], [0, 0, 1, 1], [], []>} : vector<8x256xbf16>, vector<256x96xbf16>, vector<8x96xf32> -> vector<8x96xf32>
    %c0_9 = arith.constant 0 : index
    %c0_10 = arith.constant 0 : index
    %11 = vector.load %arg5[%c0_9, %c0_10] : memref<1x96xf32, #tpu.memory_space<vmem>>, vector<1x96xf32>
    %12 = vector.broadcast %11 : vector<1x96xf32> to vector<8x96xf32>
    %13 = arith.addf %10, %12 : vector<8x96xf32>
    %cst_11 = arith.constant 0.000000e+00 : f32
    %14 = vector.broadcast %cst_11 : f32 to vector<8x96xf32>
    %15 = arith.maximumf %13, %14 : vector<8x96xf32>
    %16 = arith.truncf %15 : vector<8x96xf32> to vector<8x96xbf16>
    %c0_12 = arith.constant 0 : index
    %c0_13 = arith.constant 0 : index
    %17 = vector.load %arg6[%c0_12, %c0_13] : memref<8x96xbf16, #tpu.memory_space<vmem>>, vector<8x96xbf16>
    tpu.vector_store %arg6[%c0_12, %c0_13], %16 {strides = array<i32>} : memref<8x96xbf16, #tpu.memory_space<vmem>>, vector<8x96xbf16>,
    return
  }
  func.func @transform_0(%arg0: i32) -> (i32, i32) {
    %c0_i32 = arith.constant 0 : i32
    %c0_i32_0 = arith.constant 0 : i32
    return %arg0, %c0_i32 : i32, i32
  }
  func.func @transform_1(%arg0: i32) -> (i32, i32) {
    %c0_i32 = arith.constant 0 : i32
    %c0_i32_0 = arith.constant 0 : i32
    %c0_i32_1 = arith.constant 0 : i32
    return %c0_i32, %c0_i32_0 : i32, i32
  }
  func.func @transform_2(%arg0: i32) -> (i32, i32) {
    %c0_i32 = arith.constant 0 : i32
    %c0_i32_0 = arith.constant 0 : i32
    %c0_i32_1 = arith.constant 0 : i32
    return %c0_i32, %c0_i32_0 : i32, i32
  }
  func.func @transform_3(%arg0: i32) -> (i32, i32) {
    %c0_i32 = arith.constant 0 : i32
    %c0_i32_0 = arith.constant 0 : i32
    %c0_i32_1 = arith.constant 0 : i32
    return %c0_i32, %c0_i32_0 : i32, i32
  }
  func.func @transform_4(%arg0: i32) -> (i32, i32) {
    %c0_i32 = arith.constant 0 : i32
    %c0_i32_0 = arith.constant 0 : i32
    %c0_i32_1 = arith.constant 0 : i32
    return %c0_i32, %c0_i32_0 : i32, i32
  }
  func.func @transform_5(%arg0: i32) -> (i32, i32) {
    %c0_i32 = arith.constant 0 : i32
    %c0_i32_0 = arith.constant 0 : i32
    return %arg0, %c0_i32 : i32, i32
  }
}

</mosaic_0001>

<bundles_post_ra>
// kernel: tpu_custom_call.1
= control target key start
LH: loop header
LB: loop body
LE: loop exit
PB: predicated region body
PF: predicated region fallthrough
CT: control target
= control target key end

     0   :  { %vm53_vm0 = vcmask 261120   ;;  %s510_s0 = inlined_call_operand.vmem [shape: bf16[8,32], index: 0, kind: input, shape index: {}]   ;;  %s511_s1 = inlined_call_operand.vmem [shape: bf16[32,256], index: 1, kind: input, shape index: {}]   ;;  %s512_s2 = inlined_call_operand.vmem [shape: f32[1,256], index: 2, kind: input, shape index: {}]   ;;  %s513_s3 = inlined_call_operand.vmem [shape: bf16[256,96], index: 3, kind: input, shape index: {}]   ;;  %s514_s4 = inlined_call_operand.vmem [shape: f32[1,96], index: 4, kind: input, shape index: {}]   ;;  %s515_s5 = inlined_call_operand.hbm [shape: bf16[8,96], index: 5, kind: output, shape index: {}]  }
   0x1   :  { %v275_v0 = vld [vmem:[%s511_s1 + $0x10] sm:$0xf]  ;;  %v350_v1 = vld [vmem:[%s511_s1 + $0x14] sm:$0xf0]  ;;  %v349_v2 = vld [vmem:[%s511_s1 + $0x14] sm:$0xf] }
   0x2   :  { %v276_v3 = vor.u32 %v350_v1, %v275_v0  ;;  %v277_v4 = vld [vmem:[%s511_s1 + $0x18] sm:$0xf0]  ;;  %v267_v5 = vld [vmem:[%s511_s1] sm:$0xf]  ;;  %v348_v6 = vld [vmem:[%s511_s1 + $0x4] sm:$0xf0] }
   0x3   :  { %v280_v7 = vor.u32 %v349_v2, %v277_v4  ;;  %v347_v8 = vld [vmem:[%s511_s1 + $0x4] sm:$0xf]  ;;  %v269_v9 = vld [vmem:[%s511_s1 + $0x8] sm:$0xf0]  ;;  %v268_v10 = vor.u32 %v348_v6, %v267_v5  ;;  %v358_v11 = vld [vmem:[%s513_s3 + $0x38] sm:$0xff] }
   0x4   :  { %63 = vmatpush.bf16.msra.mxu0 %v276_v3  ;;  %v366_v12 = vld [vmem:[%s513_s3 + $0x78] sm:$0xff]  ;;  %v272_v13 = vor.u32 %v347_v8, %v269_v9  ;;  %219 = vmatpush.bf16.msra.mxu2 %v358_v11  ;;  %v357_v14 = vld [vmem:[%s513_s3 + $0x30] sm:$0xff]  ;;  %v22_v16 = vld [vmem:[%s510_s0] sm:$0xf] }
   0x5   :  { %76 = vmatpush.bf16.msra.mxu1 %v280_v7  ;;  %232 = vmatpush.bf16.msra.mxu3 %v366_v12  ;;  %v365_v15 = vld [vmem:[%s513_s3 + $0x70] sm:$0xff] }
   0x8   :  { %64 = vmatpush.bf16.msra.mxu0 %v268_v10 }
   0x9   :  { %10 = vsyncpa [#allocation3], 0  ;;  %77 = vmatpush.bf16.msra.mxu1 %v272_v13  ;;  %220 = vmatpush.bf16.msra.mxu2 %v357_v14  ;;  %v356_v17 = vld [vmem:[%s513_s3 + $0x28] sm:$0xff]  ;;  %v355_v19 = vld [vmem:[%s513_s3 + $0x20] sm:$0xff]  ;;  %s256_s21 = sshll.u32 %s515_s5, 4  ;;  %vm247_vm1 = vcmask 781312   ;;  %s257_s21 = int_to_ptr.hbm [resolvable:$true] %s256_s21 }
   0xa   :  { %233 = vmatpush.bf16.msra.mxu3 %v365_v15  ;;  %v364_v18 = vld [vmem:[%s513_s3 + $0x68] sm:$0xff]  ;;  %v363_v20 = vld [vmem:[%s513_s3 + $0x60] sm:$0xff]  ;;  %v354_v21 = vld [vmem:[%s513_s3 + $0x18] sm:$0xff] }
   0xb   :  { %281 = vmatmul.msk.bf16.vlgmr.msra.gmra.mxu0 %vm53_vm0, %v22_v16  ;;  %v362_v22 = vld [vmem:[%s513_s3 + $0x58] sm:$0xff]  ;;  %v353_v23 = vld [vmem:[%s513_s3 + $0x10] sm:$0xff]  ;;  %v352_v25 = vld [vmem:[%s513_s3 + $0x8] sm:$0xff] }
   0xc   :  { %282 = vmatmul.msk.bf16.vlgmr.msra.gmra.mxu1 %vm53_vm0, %v22_v16  ;;  %v361_v24 = vld [vmem:[%s513_s3 + $0x50] sm:$0xff]  ;;  %v360_v26 = vld [vmem:[%s513_s3 + $0x48] sm:$0xff]  ;;  %v351_v27 = vld [vmem:[%s513_s3] sm:$0xff] }
   0xd   :  { %221 = vmatpush.bf16.msra.mxu2 %v356_v17  ;;  %v359_v28 = vld [vmem:[%s513_s3 + $0x40] sm:$0xff] }
   0xe   :  { %234 = vmatpush.bf16.msra.mxu3 %v364_v18  ;;  %v27_v29 = vld [vmem:[%s512_s2] sm:$0x3]  ;;  %s395_s2 = smov [#allocation2]  }
   0xf   :  { %v29_v30 = vperm.slane %v27_v29, 0  ;;  %v30_v31 = vperm.slane %v27_v29, 1  ;;  %v368_v42 = vld [vmem:[%s514_s4] ss:$0 sm:$0xff]  ;;  %s254_s18 = sshll.u32 %s395_s2, 4  ;;  %s255_s18 = int_to_ptr.vmem [resolvable:$true] %s254_s18 }
  0x11   :  { %222 = vmatpush.bf16.msra.mxu2 %v355_v19 }
  0x12   :  { %235 = vmatpush.bf16.msra.mxu3 %v363_v20 }
  0x15   :  { %223 = vmatpush.bf16.msra.mxu2 %v354_v21 }
  0x16   :  { %236 = vmatpush.bf16.msra.mxu3 %v362_v22 }
  0x19   :  { %224 = vmatpush.bf16.msra.mxu2 %v353_v23 }
  0x1a   :  { %237 = vmatpush.bf16.msra.mxu3 %v361_v24 }
  0x1d   :  { %225 = vmatpush.bf16.msra.mxu2 %v352_v25 }
  0x1e   :  { %238 = vmatpush.bf16.msra.mxu3 %v360_v26 }
  0x21   :  { %226 = vmatpush.bf16.msra.mxu2 %v351_v27 }
  0x22   :  { %239 = vmatpush.bf16.msra.mxu3 %v359_v28 }
  0x88   :  { %v66_v32 = vpop.f32.mrf.mxu0 }
  0x89   :  { %v67_v33 = vadd.f32 %v66_v32, %v29_v30  ;;  %v79_v34 = vpop.f32.mrf.mxu1 }
  0x8a   :  { %v80_v35 = vadd.f32 %v79_v34, %v30_v31 }
  0x8b   :  { %v83_v36 = vmax.f32 %v67_v33, 0.0 }
  0x8c   :  { %v84_v37 = vmax.f32 %v80_v35, 0.0 }
  0x8d   :  { %v85_v38 = vpack.c.bf16 %v83_v36, %v83_v36 }
  0x8e   :  { %v86_v39 = vpack.c.bf16 %v84_v37, %v84_v37 }
  0x8f   :  { %227 = vmatmul.bf16.vlgmr.msra.gmra.mxu2 %v85_v38 }
  0x90   :  { %240 = vmatmul.bf16.vlgmr.msra.gmra.mxu3 %v86_v39  ;;  %v68_v40 = vpop.f32.mrf.mxu0 }
  0x91   :  { %v81_v41 = vpop.f32.mrf.mxu1 }
 0x112   :  { %v228_v43 = vpop.f32.mrf.mxu2 }
 0x113   :  { %v229_v44 = vadd.f32 %v368_v42, %v228_v43  ;;  %v241_v45 = vpop.f32.mrf.mxu3 }
 0x115   :  { %v242_v46 = vadd.f32 %v241_v45, %v229_v44 }
 0x117   :  { %v245_v47 = vmax.f32 %v242_v46, 0.0 }
 0x119   :  { %v246_v48 = vpack.c.bf16 %v245_v47, %v245_v47 }
 0x11a   :  { %v230_v49 = vpop.f32.mrf.mxu2 }
 0x11b   :  { %v243_v50 = vpop.f32.mrf.mxu3  ;;  %248 = vst.msk [vmem:[#allocation2] sm:$0xf] %vm247_vm1, %v246_v48 }
 0x11c   :  { %259 = dma.vmem_to_hbm [thread:$0]  %s255_s18, 64, %s257_s21, [#allocation3]  }
 0x11d   :  { %393 = dma.done.wait [#allocation3], 64  }
 0x11e   :  { %394 = vsyncadd [#allocation3], 4294967232 }
 0x11f   :  { %264 = vsyncpa [#allocation3], 1 }

</bundles_post_ra>
